<compile_context>
chip_gen: v7x
topology: tpu7x:2x2x1
jax: 0.10.0
libtpu: 0.0.40
codegen_flags: <defaults>
</compile_context>

<pallas_src>
import math

import jax
import jax.numpy as jnp
from jax.experimental import pallas as pl
from jax.experimental.pallas import tpu as pltpu


def _round_up(x, m):
    return (x + m - 1) // m * m


def _round_down(x, m):
    return max(m, x // m * m)


# --------------------------------- kernels ---------------------------------


def _noisy_train_kernel(x_ref, wmuT_ref, wsigT_ref, eps_in_ref, eps_out_ref,
                        bias_ref, o_ref):
    x = x_ref[...]                                   # (tb, in_f) f32
    x_noisy = x * eps_in_ref[...]                    # rank-1 input-side noise
    wmu = wmuT_ref[...]                              # (in_f, tn) f32/bf16
    wsig = wsigT_ref[...]
    y_mu = jnp.dot(x.astype(wmu.dtype), wmu,
                   preferred_element_type=jnp.float32)          # (tb, tn)
    y_sig = jnp.dot(x_noisy.astype(wsig.dtype), wsig,
                    preferred_element_type=jnp.float32)         # (tb, tn)
    # eps_out doubles as bias_epsilon; bias_ref is pre-combined in the wrapper.
    o_ref[...] = (y_mu + y_sig * eps_out_ref[...]
                  + bias_ref[...]).astype(o_ref.dtype)


def _noisy_eval_kernel(x_ref, wmuT_ref, bmu_ref, o_ref):
    wmu = wmuT_ref[...]
    y = jnp.dot(x_ref[...].astype(wmu.dtype), wmu,
                preferred_element_type=jnp.float32)             # (tb, tn)
    o_ref[...] = (y + bmu_ref[...]).astype(o_ref.dtype)


# ------------------------------ tile planning -------------------------------


def _vmem_budget_bytes():
    try:
        cap = int(pltpu.get_tpu_info().vmem_capacity_bytes)
    except Exception:
        cap = 64 << 20                      # conservative (v7x-sized) fallback
    # ~60% of physical: ~38 MiB on v7x (64 MiB), ~76 MiB on v5e/v6e (128 MiB).
    return min(int(cap * 0.6), 96 << 20), cap


def make_plan(batch, in_features, out_features, *,
              weight_dtype=jnp.bfloat16, x_dtype=jnp.float32,
              is_training=True, tb_max=256, tn_max=2048):
    """Pick tile sizes / VMEM limit once per layer shape (not per call)."""
    wbytes = jnp.dtype(weight_dtype).itemsize
    xbytes = jnp.dtype(x_dtype).itemsize
    budget, cap = _vmem_budget_bytes()

    b_pad = _round_up(batch, 8)
    tb = min(b_pad, _round_up(tb_max, 8))

    n_w = 2 if is_training else 1           # weight tiles DMA'd per grid step
    out_128 = _round_up(out_features, 128)

    def step_bytes(tn):
        # BlockSpec double-buffers every blocked operand.
        return (2 * tb * in_features * xbytes            # x tile
                + 2 * n_w * in_features * tn * wbytes    # weight tile(s)
                + 2 * in_features * 4                    # eps_in row
                + 2 * 2 * tn * 4                         # eps_out + bias rows
                + 2 * tb * tn * 4)                       # output tile

    # Largest lane-multiple output tile that fits the VMEM budget.
    tn = 128
    while tn + 128 <= tn_max and step_bytes(tn + 128) <= budget:
        tn += 128
    tn = min(tn, out_128)
    # Guarantee >= 2 output tiles so pipelining / megacore can engage.
    if out_128 >= 256:
        tn = min(tn, _round_down(out_128 // 2, 128))

    out_pad = _round_up(out_features, tn)   # pad a few lanes, never shrink tn

    sb = step_bytes(tn)
    vmem_limit = int(min(budget, max(8 << 20, 2 * sb)))
    if sb > vmem_limit:                     # huge in_features: raise the limit
        vmem_limit = int(min(sb + (4 << 20), cap - (4 << 20)))

    return dict(tn=tn, tb=tb, out_pad=out_pad, vmem_limit=vmem_limit,
                weight_dtype=weight_dtype, in_features=in_features,
                out_features=out_features)


# --------------------- one-time parameter layout prep ------------------------


def prepare_params(weight_mu, weight_sigma, bias_mu, bias_sigma, *, plan):
    """(out_f, in_f) -> (in_f, out_pad) once per parameter update (not per call)."""
    out_f = plan["out_features"]
    out_pad = plan["out_pad"]
    wdt = plan["weight_dtype"]

    def pad_T(w):
        wT = w.T
        if out_pad != out_f:
            wT = jnp.pad(wT, ((0, 0), (0, out_pad - out_f)))
        return wT.astype(wdt)

    def pad_row(v):
        v = v.reshape(1, out_f).astype(jnp.float32)
        if out_pad != out_f:
            v = jnp.pad(v, ((0, 0), (0, out_pad - out_f)))
        return v

    return dict(wmuT=pad_T(weight_mu), wsigT=pad_T(weight_sigma),
                bmu=pad_row(bias_mu), bsig=pad_row(bias_sigma))


# --------------------------------- forward ---------------------------------


def noisy_linear(x, params, eps_in, eps_out, *, plan, is_training=True):
    """Forward of FactorizedNoisyLinear with pre-prepared params."""
    B, in_f = x.shape
    assert in_f == plan["in_features"]
    out_f = plan["out_features"]
    out_pad = plan["out_pad"]
    tn = plan["tn"]

    # Batch tiling: innermost grid axis -> weight tiles not re-DMA'd across it.
    tb = plan["tb"]
    b_pad = _round_up(B, 8)
    if b_pad > tb:
        b_pad = _round_up(B, tb)
    else:
        tb = b_pad
    if b_pad != B:
        x = jnp.pad(x, ((0, b_pad - B), (0, 0)))

    grid = (out_pad // tn, b_pad // tb)

    x_spec = pl.BlockSpec((tb, in_f), lambda j, i: (i, 0))
    w_spec = pl.BlockSpec((in_f, tn), lambda j, i: (0, j))
    row_spec = pl.BlockSpec((1, tn), lambda j, i: (0, j))
    o_spec = pl.BlockSpec((tb, tn), lambda j, i: (i, j))

    wbytes = jnp.dtype(plan["weight_dtype"]).itemsize
    f32b = 4
    n_w = 2 if is_training else 1
    cost = pl.CostEstimate(
        flops=2 * n_w * b_pad * in_f * out_pad + 6 * b_pad * out_pad,
        transcendentals=0,
        bytes_accessed=(f32b * b_pad * in_f + n_w * wbytes * in_f * out_pad
                        + f32b * (in_f + 3 * out_pad)
                        + f32b * b_pad * out_pad),
    )
    cparams = pltpu.CompilerParams(
        dimension_semantics=("parallel", "parallel"),
        vmem_limit_bytes=plan["vmem_limit"])

    if is_training:
        eps_out_row = eps_out.reshape(1, out_f).astype(jnp.float32)
        if out_pad != out_f:
            eps_out_row = jnp.pad(eps_out_row, ((0, 0), (0, out_pad - out_f)))
        # Pre-combine bias (O(out_f) in the wrapper -> one fewer operand/step).
        bias_eff = params["bmu"] + params["bsig"] * eps_out_row
        eps_in_row = eps_in.reshape(1, in_f).astype(jnp.float32)

        y_pad = pl.pallas_call(
            _noisy_train_kernel,
            out_shape=jax.ShapeDtypeStruct((b_pad, out_pad), x.dtype),
            grid=grid,
            in_specs=[x_spec, w_spec, w_spec,
                      pl.BlockSpec((1, in_f), lambda j, i: (0, 0)),
                      row_spec, row_spec],
            out_specs=o_spec,
            compiler_params=cparams,
            cost_estimate=cost,
        )(x, params["wmuT"], params["wsigT"], eps_in_row, eps_out_row, bias_eff)
    else:
        # Lean eval path: only mu parameters are ever DMA'd.
        y_pad = pl.pallas_call(
            _noisy_eval_kernel,
            out_shape=jax.ShapeDtypeStruct((b_pad, out_pad), x.dtype),
            grid=grid,
            in_specs=[x_spec, w_spec, row_spec],
            out_specs=o_spec,
            compiler_params=cparams,
            cost_estimate=cost,
        )(x, params["wmuT"], params["bmu"])

    if out_pad != out_f or b_pad != B:
        y_pad = y_pad[:B, :out_f]
    return y_pad


# -------------- deterministic parameter / noise construction ---------------


def _scale_noise(key, size):
    v = jax.random.normal(key, (size,), dtype=jnp.float32)
    return jnp.sign(v) * jnp.sqrt(jnp.abs(v))


def make_params(key, in_features, out_features, std_init=0.5):
    k_wmu, k_bmu, k_ein, k_eout = jax.random.split(key, 4)
    std = 1.0 / math.sqrt(in_features)
    weight_mu = jax.random.uniform(
        k_wmu, (out_features, in_features), minval=-std, maxval=std,
        dtype=jnp.float32)
    weight_sigma = jnp.full((out_features, in_features),
                            std_init / math.sqrt(in_features), jnp.float32)
    bias_mu = jax.random.uniform(
        k_bmu, (out_features,), minval=-std, maxval=std, dtype=jnp.float32)
    bias_sigma = jnp.full((out_features,),
                          std_init / math.sqrt(in_features), jnp.float32)
    # factorized noise vectors (weight_epsilon = eps_out ⊗ eps_in, never built)
    eps_in = _scale_noise(k_ein, in_features)
    eps_out = _scale_noise(k_eout, out_features)
    return weight_mu, weight_sigma, bias_mu, bias_sigma, eps_in, eps_out


if __name__ == "__main__":
    batch, in_features, out_features = 8, 32, 64

    key = jax.random.PRNGKey(0)
    k_params, k_x = jax.random.split(key)
    wmu, wsig, bmu, bsig, eps_in, eps_out = make_params(
        k_params, in_features, out_features)
    x = jax.random.normal(k_x, (batch, in_features), dtype=jnp.float32)

    # References (explicit PyTorch formulation).
    weight_epsilon = jnp.outer(eps_out, eps_in)
    w_ref = wmu + wsig * weight_epsilon
    b_ref = bmu + bsig * eps_out
    y_train_ref = x @ w_ref.T + b_ref
    y_eval_ref = x @ wmu.T + bmu

    # --- f32 weight storage (matches the PyTorch f32 reference closely) ----
    plan32 = make_plan(batch, in_features, out_features,
                       weight_dtype=jnp.float32)
    params32 = prepare_params(wmu, wsig, bmu, bsig, plan=plan32)  # one-time
    y = jax.block_until_ready(
        noisy_linear(x, params32, eps_in, eps_out, plan=plan32,
                     is_training=True))
    assert jnp.allclose(y, y_train_ref, atol=1e-4, rtol=1e-4), \
        "train-mode (f32 weights) mismatch"

    y_eval = jax.block_until_ready(
        noisy_linear(x, params32, eps_in, eps_out, plan=plan32,
                     is_training=False))
    assert jnp.allclose(y_eval, y_eval_ref, atol=1e-4, rtol=1e-4), \
        "eval-mode (f32 weights) mismatch"

    # --- bf16 weight storage (half the weight HBM bytes, f32 accumulate) ---
    plan16 = make_plan(batch, in_features, out_features,
                       weight_dtype=jnp.bfloat16)
    params16 = prepare_params(wmu, wsig, bmu, bsig, plan=plan16)  # one-time
    y16 = jax.block_until_ready(
        noisy_linear(x, params16, eps_in, eps_out, plan=plan16,
                     is_training=True))
    assert jnp.allclose(y16, y_train_ref, atol=5e-2, rtol=5e-2), \
        "train-mode (bf16 weights) mismatch"

    print("KERNEL_OK")
</pallas_src>

<mosaic_0001>
module attributes {stable_mosaic.version = 11 : i64} {
  func.func @_noisy_train_kernel(%arg0: i32, %arg1: i32, %arg2: memref<8x32xf32, #tpu.memory_space<vmem>>, %arg3: memref<32x128xf32, #tpu.memory_space<vmem>>, %arg4: memref<32x128xf32, #tpu.memory_space<vmem>>, %arg5: memref<1x32xf32, #tpu.memory_space<vmem>>, %arg6: memref<1x128xf32, #tpu.memory_space<vmem>>, %arg7: memref<1x128xf32, #tpu.memory_space<vmem>>, %arg8: memref<8x128xf32, #tpu.memory_space<vmem>>) attributes {dimension_semantics = [#tpu.dimension_semantics<parallel>, #tpu.dimension_semantics<parallel>], iteration_bounds = array<i64: 1, 1>, scalar_prefetch = 0 : i64, scratch_operands = 0 : i64, tpu.core_type = #tpu.core_type<tc>, window_params = [{transform_indices = @transform_0, window_bounds = array<i64: 8, 32>}, {transform_indices = @transform_1, window_bounds = array<i64: 32, 128>}, {transform_indices = @transform_2, window_bounds = array<i64: 32, 128>}, {pipeline_mode = #tpu.pipeline_mode<synchronous>, transform_indices = @transform_3, window_bounds = array<i64: 1, 32>}, {transform_indices = @transform_4, window_bounds = array<i64: 1, 128>}, {transform_indices = @transform_5, window_bounds = array<i64: 1, 128>}, {transform_indices = @transform_6, window_bounds = array<i64: 8, 128>}]} {
    %c0 = arith.constant 0 : index
    %c0_0 = arith.constant 0 : index
    %0 = vector.load %arg2[%c0, %c0_0] : memref<8x32xf32, #tpu.memory_space<vmem>>, vector<8x32xf32>
    %c0_1 = arith.constant 0 : index
    %c0_2 = arith.constant 0 : index
    %1 = vector.load %arg5[%c0_1, %c0_2] : memref<1x32xf32, #tpu.memory_space<vmem>>, vector<1x32xf32>
    %2 = vector.broadcast %1 : vector<1x32xf32> to vector<8x32xf32>
    %3 = arith.mulf %0, %2 : vector<8x32xf32>
    %c0_3 = arith.constant 0 : index
    %c0_4 = arith.constant 0 : index
    %4 = vector.load %arg3[%c0_3, %c0_4] : memref<32x128xf32, #tpu.memory_space<vmem>>, vector<32x128xf32>
    %c0_5 = arith.constant 0 : index
    %c0_6 = arith.constant 0 : index
    %5 = vector.load %arg4[%c0_5, %c0_6] : memref<32x128xf32, #tpu.memory_space<vmem>>, vector<32x128xf32>
    %cst = arith.constant dense<0.000000e+00> : vector<8x128xf32>
    %6 = tpu.matmul %0, %4, %cst {dimension_numbers = #tpu.dot_dimension_numbers<[1], [0], [0], [1], [0, 0, 1, 1], [], []>} : vector<8x32xf32>, vector<32x128xf32>, vector<8x128xf32> -> vector<8x128xf32>
    %cst_7 = arith.constant dense<0.000000e+00> : vector<8x128xf32>
    %7 = tpu.matmul %3, %5, %cst_7 {dimension_numbers = #tpu.dot_dimension_numbers<[1], [0], [0], [1], [0, 0, 1, 1], [], []>} : vector<8x32xf32>, vector<32x128xf32>, vector<8x128xf32> -> vector<8x128xf32>
    %c0_8 = arith.constant 0 : index
    %c0_9 = arith.constant 0 : index
    %8 = vector.load %arg6[%c0_8, %c0_9] : memref<1x128xf32, #tpu.memory_space<vmem>>, vector<1x128xf32>
    %9 = vector.broadcast %8 : vector<1x128xf32> to vector<8x128xf32>
    %10 = arith.mulf %7, %9 : vector<8x128xf32>
    %11 = arith.addf %6, %10 : vector<8x128xf32>
    %c0_10 = arith.constant 0 : index
    %c0_11 = arith.constant 0 : index
    %12 = vector.load %arg7[%c0_10, %c0_11] : memref<1x128xf32, #tpu.memory_space<vmem>>, vector<1x128xf32>
    %13 = vector.broadcast %12 : vector<1x128xf32> to vector<8x128xf32>
    %14 = arith.addf %11, %13 : vector<8x128xf32>
    %c0_12 = arith.constant 0 : index
    %c0_13 = arith.constant 0 : index
    %15 = vector.load %arg8[%c0_12, %c0_13] : memref<8x128xf32, #tpu.memory_space<vmem>>, vector<8x128xf32>
    tpu.vector_store %arg8[%c0_12, %c0_13], %14 {strides = array<i32>} : memref<8x128xf32, #tpu.memory_space<vmem>>, vector<8x128xf32>,
    return
  }
  func.func @transform_0(%arg0: i32, %arg1: i32) -> (i32, i32) {
    %c0_i32 = arith.constant 0 : i32
    %c0_i32_0 = arith.constant 0 : i32
    return %arg1, %c0_i32 : i32, i32
  }
  func.func @transform_1(%arg0: i32, %arg1: i32) -> (i32, i32) {
    %c0_i32 = arith.constant 0 : i32
    %c0_i32_0 = arith.constant 0 : i32
    return %c0_i32, %arg0 : i32, i32
  }
  func.func @transform_2(%arg0: i32, %arg1: i32) -> (i32, i32) {
    %c0_i32 = arith.constant 0 : i32
    %c0_i32_0 = arith.constant 0 : i32
    return %c0_i32, %arg0 : i32, i32
  }
  func.func @transform_3(%arg0: i32, %arg1: i32) -> (i32, i32) {
    %c0_i32 = arith.constant 0 : i32
    %c0_i32_0 = arith.constant 0 : i32
    %c0_i32_1 = arith.constant 0 : i32
    return %c0_i32, %c0_i32_0 : i32, i32
  }
  func.func @transform_4(%arg0: i32, %arg1: i32) -> (i32, i32) {
    %c0_i32 = arith.constant 0 : i32
    %c0_i32_0 = arith.constant 0 : i32
    return %c0_i32, %arg0 : i32, i32
  }
  func.func @transform_5(%arg0: i32, %arg1: i32) -> (i32, i32) {
    %c0_i32 = arith.constant 0 : i32
    %c0_i32_0 = arith.constant 0 : i32
    return %c0_i32, %arg0 : i32, i32
  }
  func.func @transform_6(%arg0: i32, %arg1: i32) -> (i32, i32) {
    %c0_i32 = arith.constant 0 : i32
    return %arg1, %arg0 : i32, i32
  }
}

</mosaic_0001>

<bundles_post_ra>
// kernel: tpu_custom_call.1
= control target key start
LH: loop header
LB: loop body
LE: loop exit
PB: predicated region body
PF: predicated region fallthrough
CT: control target
= control target key end

     0   :  { %11 = vsyncpa [#allocation3], 0  ;;  %s519_s0 = inlined_call_operand.hbm [shape: f32[8,32], index: 0, kind: input, shape index: {}]   ;;  %s520_s1 = inlined_call_operand.hbm [shape: f32[32,128], index: 1, kind: input, shape index: {}]   ;;  %s521_s2 = inlined_call_operand.hbm [shape: f32[32,128], index: 2, kind: input, shape index: {}]   ;;  %s522_s3 = inlined_call_operand.vmem [shape: f32[1,32], index: 3, kind: input, shape index: {}]   ;;  %s523_s4 = inlined_call_operand.vmem [shape: f32[1,128], index: 4, kind: input, shape index: {}]   ;;  %s524_s5 = inlined_call_operand.vmem [shape: f32[1,128], index: 5, kind: input, shape index: {}]   ;;  %s525_s6 = inlined_call_operand.hbm [shape: f32[8,128], index: 6, kind: output, shape index: {}]  }
   0x1   :  { %12 = vsyncpa [#allocation6], 0 }
   0x2   :  { %13 = vsyncpa [#allocation4], 0  ;;  %s412_s21 = smov [#allocation5]   ;;  %s318_s25 = scalar_lea.hbm %s520_s1, 512 }
   0x3   :  { %s29_s22 = sshll.u32 %s412_s21, 4  ;;  %p319_p0 = scmp.ne.s32.totalorder %s520_s1, %s318_s25  ;;  %s30_s22 = int_to_ptr.vmem [resolvable:$true] %s29_s22 }
   0x4   :  { %p322_p1 = scmp.lt.u32.totalorder %s318_s25, %s520_s1 }
   0x6   :  { %p324_p2 = pnand %p322_p1, %p319_p0 }
   0x8   :  { %327 = shalt.err (!%p324_p2)
}
   0x9   :  { %s328_s30 = scalar_lea.vmem %s30_s22, 512  ;;  %p333_p4 = scmp.lt.s32.totalorder %s30_s22, %s30_s22 }
   0xa   :  { %p329_p3 = scmp.ne.s32.totalorder %s30_s22, %s328_s30  ;;  %p334_p5 = scmp.lt.s32.totalorder %s328_s30, %s328_s30 }
   0xc   :  { %p335_p6 = por %p334_p5, %p333_p4 }
   0xe   :  { %p336_p7 = pnand %p335_p6, %p329_p3 }
  0x10   :  { %339 = shalt.err (!%p336_p7)
}
  0x11   :  { %s413_s7 = smov 128   ;;  %s414_s8 = smov 8  }
  0x12   :  { %35 = dma.hbm_to_vmem [thread:$0]  %s520_s1, 512, %s30_s22, [#allocation6], %s413_s7, %s413_s7, %s414_s8  }
  0x13   :  { %s415_s11 = smov [#allocation2]   ;;  %s416_s13 = smov [#allocation7]  }
  0x14   :  { %s20_s12 = sshll.u32 %s415_s11, 4  ;;  %s41_s14 = sshll.u32 %s416_s13, 4  ;;  %s21_s12 = int_to_ptr.vmem [resolvable:$true] %s20_s12  ;;  %s42_s14 = int_to_ptr.vmem [resolvable:$true] %s41_s14 }
  0x15   :  { %s340_s17 = scalar_lea.hbm %s519_s0, 128 }
  0x16   :  { %p341_p8 = scmp.ne.s32.totalorder %s519_s0, %s340_s17  ;;  %p344_p9 = scmp.lt.u32.totalorder %s340_s17, %s519_s0 }
  0x18   :  { %p346_p10 = pnand %p344_p9, %p341_p8 }
  0x1a   :  { %349 = shalt.err (!%p346_p10)
}
  0x1b   :  { %s350_s1 = scalar_lea.vmem %s21_s12, 128  ;;  %p355_p12 = scmp.lt.s32.totalorder %s21_s12, %s21_s12 }
  0x1c   :  { %p351_p11 = scmp.ne.s32.totalorder %s21_s12, %s350_s1  ;;  %p356_p13 = scmp.lt.s32.totalorder %s350_s1, %s350_s1 }
  0x1e   :  { %p357_p0 = por %p356_p13, %p355_p12 }
  0x20   :  { %p358_p1 = pnand %p357_p0, %p351_p11 }
  0x22   :  { %361 = shalt.err (!%p358_p1)
}
  0x23   :  { %23 = dma.hbm_to_vmem [thread:$0]  %s519_s0, 128, %s21_s12, [#allocation3]  }
  0x24   :  { %s362_s26 = scalar_lea.hbm %s521_s2, 512 }
  0x25   :  { %p363_p2 = scmp.ne.s32.totalorder %s521_s2, %s362_s26  ;;  %p366_p3 = scmp.lt.u32.totalorder %s362_s26, %s521_s2 }
  0x27   :  { %p368_p4 = pnand %p366_p3, %p363_p2 }
  0x29   :  { %371 = shalt.err (!%p368_p4)
}
  0x2a   :  { %s372_s9 = scalar_lea.vmem %s42_s14, 512  ;;  %p377_p6 = scmp.lt.s32.totalorder %s42_s14, %s42_s14 }
  0x2b   :  { %p373_p5 = scmp.ne.s32.totalorder %s42_s14, %s372_s9  ;;  %p378_p7 = scmp.lt.s32.totalorder %s372_s9, %s372_s9 }
  0x2d   :  { %p379_p8 = por %p378_p7, %p377_p6 }
  0x2f   :  { %p380_p9 = pnand %p379_p8, %p373_p5 }
  0x31   :  { %383 = shalt.err (!%p380_p9)
}
  0x32   :  { %47 = dma.hbm_to_vmem [thread:$0]  %s521_s2, 512, %s42_s14, [#allocation6], %s413_s7, %s413_s7, %s414_s8  }
  0x33   :  { %406 = dma.done.wait [#allocation3], 128  }
  0x34   :  { %407 = vsyncadd [#allocation3], 4294967168 }
  0x35   :  { %408 = dma.done.wait [#allocation6], 1024  }
  0x36   :  { %409 = vsyncadd [#allocation6], 4294966272  ;;  %v417_v0 = vmov 0.0|0.0   ;;  %vm418_vm0 = vmmov 0   ;;  %v419_v1 = vmov 0.0   ;;  %v76_v2 = vld [vmem:[#allocation7] sm:$0xff] }
  0x37   :  { %297 = vmatprep.subr.bf16.mxu0 %v417_v0  ;;  %303 = vmatprep.subr.bf16.mxu1 %v417_v0  ;;  %v77_v3 = vld [vmem:[#allocation7 + $0x8] sm:$0xff]  ;;  %v72_v4 = vld [vmem:[#allocation5] sm:$0xff]  ;;  %v78_v7 = vld [vmem:[#allocation7 + $0x10] sm:$0xff]  ;;  %vm80_vm1 = vcmask 261120   ;;  %s420_s13 = smov [#allocation8]  }
  0x38   :  { %283 = vmatprep.mubr.msk.f32.mxu0 %vm418_vm0, %v419_v1  ;;  %294 = vmatprep.mubr.msk.f32.mxu1 %vm418_vm0, %v419_v1  ;;  %v298_v5 = vpack.c.bf16 %v77_v3, %v76_v2  ;;  %v73_v6 = vld [vmem:[#allocation5 + $0x8] sm:$0xff]  ;;  %v79_v8 = vld [vmem:[#allocation7 + $0x18] sm:$0xff]  ;;  %v74_v10 = vld [vmem:[#allocation5 + $0x10] sm:$0xff]  ;;  %s250_s14 = sshll.u32 %s420_s13, 4  ;;  %s251_s14 = int_to_ptr.vmem [resolvable:$true] %s250_s14 }
  0x39   :  { %v304_v9 = vpack.c.bf16 %v73_v6, %v72_v4  ;;  %v75_v11 = vld [vmem:[#allocation5 + $0x18] sm:$0xff]  ;;  %v301_v12 = vpack.c.bf16 %v79_v8, %v78_v7  ;;  %s384_s15 = scalar_lea.vmem %s251_s14, 128  ;;  %p389_p11 = scmp.lt.s32.totalorder %s251_s14, %s251_s14 }
  0x3a   :  { %299 = vmatpush3.bf16.msra.mxu0 %v298_v5  ;;  %v63_v13 = vld [vmem:[#allocation2] sm:$0xff]  ;;  %v307_v15 = vpack.c.bf16 %v75_v11, %v74_v10  ;;  %p385_p10 = scmp.ne.s32.totalorder %s251_s14, %s384_s15  ;;  %p390_p12 = scmp.lt.s32.totalorder %s384_s15, %s384_s15 }
  0x3b   :  { %v260_v14 = vld [vmem:[%s522_s3] ss:$0 sm:$0xff]  ;;  %305 = vmatpush3.bf16.msra.mxu1 %v304_v9  ;;  %300 = vmatprep.subr.bf16.mxu0 %v417_v0 }
  0x3c   :  { %306 = vmatprep.subr.bf16.mxu1 %v417_v0  ;;  %v71_v16 = vmul.f32 %v260_v14, %v63_v13  ;;  %v262_v17 = vld [vmem:[%s523_s4] ss:$0 sm:$0xff]  ;;  %p391_p13 = por %p390_p12, %p389_p11 }
  0x3d   :  { %v264_v22 = vld [vmem:[%s524_s5] ss:$0 sm:$0xff] }
  0x3e   :  { %302 = vmatpush3.bf16.msra.mxu0 %v301_v12  ;;  %p392_p0 = pnand %p391_p13, %p385_p10 }
  0x3f   :  { %308 = vmatpush3.bf16.msra.mxu1 %v307_v15 }
  0x41   :  { %284 = vmatmul.mubr.msk.f32.vlgmr.msra.gmra.mrb[0].mxu0 %vm80_vm1, %v71_v16 }
  0x42   :  { %295 = vmatmul.mubr.msk.f32.vlgmr.msra.gmra.mrb[0].mxu1 %vm80_vm1, %v63_v13 }
 0x114   :  { %v150_v18 = vpop.f32.mrb[0].mxu0 }
 0x115   :  { %v161_v19 = vmul.f32 %v262_v17, %v150_v18  ;;  %v285_v20 = vpop.f32.mrb[1].mxu0  ;;  %v231_v21 = vpop.f32.mrb[0].mxu1 }
 0x116   :  { %v296_v23 = vpop.f32.mrb[1].mxu1 }
 0x117   :  { %v232_v24 = vadd.f32 %v231_v21, %v161_v19 }
 0x119   :  { %v242_v25 = vadd.f32 %v264_v22, %v232_v24 }
 0x11b   :  { %243 = vst [vmem:[#allocation8] sm:$0xff] %v242_v25 }
 0x11c   :  { %395 = shalt.err (!%p392_p0)
}
 0x11d   :  { %s396_s17 = scalar_lea.hbm %s525_s6, 128 }
 0x11e   :  { %p397_p1 = scmp.ne.s32.totalorder %s525_s6, %s396_s17  ;;  %p400_p2 = scmp.lt.u32.totalorder %s396_s17, %s525_s6 }
 0x120   :  { %p402_p3 = pnand %p400_p2, %p397_p1 }
 0x122   :  { %405 = shalt.err (!%p402_p3)
}
 0x123   :  { %253 = dma.vmem_to_hbm [thread:$0]  %s251_s14, 128, %s525_s6, [#allocation4]  }
 0x124   :  { %410 = dma.done.wait [#allocation4], 128  }
 0x125   :  { %411 = vsyncadd [#allocation4], 4294967168 }
 0x126   :  { %257 = vsyncpa [#allocation3], 1 }
 0x127   :  { %258 = vsyncpa [#allocation6], 1 }
 0x128   :  { %259 = vsyncpa [#allocation4], 1 }

</bundles_post_ra>
